<compile_context>
chip_gen: v7x
topology: tpu7x:2x2x1
jax: 0.10.0
libtpu: 0.0.40
codegen_flags: <defaults>
</compile_context>

<pallas_src>
import jax
import jax.numpy as jnp
from jax.experimental import pallas as pl
from jax.experimental.pallas import tpu as pltpu

_LANES = 128
_MIB = 1024 * 1024
_TM_DEFAULT = 512      # output-row tile
_TK_DEFAULT = 1024     # contraction (A-column) tile
_VMEM_CAP_CACHE = None


def _round_up(x, m):
    return ((x + m - 1) // m) * m


def _pad2d(a, rows, cols, dtype):
    a = jnp.asarray(a)
    out = jnp.zeros((rows, cols), dtype=dtype)
    return out.at[: a.shape[0], : a.shape[1]].set(a.astype(dtype))


# ----------------------------------------------------------------------------
# Generation-aware budgets.
# ----------------------------------------------------------------------------
def _vmem_capacity_bytes():
    global _VMEM_CAP_CACHE
    if _VMEM_CAP_CACHE is None:
        cap = None
        try:
            cap = getattr(pltpu.get_tpu_info(), "vmem_capacity_bytes", None)
        except Exception:
            cap = None
        if not cap or cap <= 0:
            cap = 64 * _MIB          # conservative fallback = v7x per-TC VMEM
        _VMEM_CAP_CACHE = int(cap)
    return _VMEM_CAP_CACHE


def _fused_max_nodes_default():
    # 128 MiB VMEM chips (v5e/v6e): fused A-resident path up to ~4k nodes.
    # Small-VMEM / 2-TC chips (v7x): prefer the row-parallel tiled path above
    # a few hundred nodes (fused grid=(1,) cannot shard across TensorCores).
    return 4096 if _vmem_capacity_bytes() >= 100 * _MIB else 512


def _fused_vmem_limit():
    return max(min(_vmem_capacity_bytes() - 16 * _MIB, 100 * _MIB), 32 * _MIB)


def _tiled_vmem_limit():
    return max(min(_vmem_capacity_bytes() - 16 * _MIB, 64 * _MIB), 32 * _MIB)


# ----------------------------------------------------------------------------
# Kernel 1: fused whole-array path (A_hat read from HBM once for BOTH layers).
# ----------------------------------------------------------------------------
def _gcn_fused_kernel(adj_ref, x_ref, w1_ref, b1_ref, w2_ref, b2_ref,
                      out_ref, hid_ref):
    adj = adj_ref[...]                                               # (N, N) bf16
    # Layer 1 (reassociated): (A @ X) @ W1 + b1   -- channel matmul in bf16.
    ax = jnp.dot(adj, x_ref[...], preferred_element_type=jnp.float32)
    h1 = (jnp.dot(ax.astype(jnp.bfloat16), w1_ref[...],
                  preferred_element_type=jnp.float32) + b1_ref[...])
    hid_ref[...] = h1                                                # x_hidden (pre-relu)
    # TODO(synk): training-mode dropout (p=0.5) would use pltpu.prng_* here.
    h1r = jnp.maximum(h1, 0.0).astype(jnp.bfloat16)
    # Layer 2 (reassociated): (A @ relu(h1)) @ W2 + b2
    ah = jnp.dot(adj, h1r, preferred_element_type=jnp.float32)
    out_ref[...] = (jnp.dot(ah.astype(jnp.bfloat16), w2_ref[...],
                            preferred_element_type=jnp.float32) + b2_ref[...])


def _fused_call(adj, xp, w1p, b1p, w2p, b2p):
    n = adj.shape[0]
    hp = w1p.shape[1]
    op = w2p.shape[1]

    def full(shape):
        return pl.BlockSpec(shape, lambda i: (0,) * len(shape))

    return pl.pallas_call(
        _gcn_fused_kernel,
        out_shape=(
            jax.ShapeDtypeStruct((n, op), jnp.float32),
            jax.ShapeDtypeStruct((n, hp), jnp.float32),
        ),
        grid_spec=pltpu.PrefetchScalarGridSpec(
            num_scalar_prefetch=0,
            grid=(1,),
            in_specs=[full(adj.shape), full(xp.shape), full(w1p.shape),
                      full(b1p.shape), full(w2p.shape), full(b2p.shape)],
            out_specs=[full((n, op)), full((n, hp))],
        ),
        compiler_params=pltpu.CompilerParams(
            dimension_semantics=("arbitrary",),
            vmem_limit_bytes=_fused_vmem_limit()),
    )(adj, xp, w1p, b1p, w2p, b2p)


# ----------------------------------------------------------------------------
# Kernel 2: tiled "propagate then transform", one call per GCN layer:
#     Y = (A_hat @ U) @ W + b        (optionally also emits relu(Y) in bf16)
# grid = (row tiles "parallel", contraction tiles "arbitrary"); f32 VMEM
# accumulator init/finalized with pl.when (pattern P3).
# ----------------------------------------------------------------------------
def _make_layer_kernel(*, tk, u_resident, with_relu_out):
    def kernel(adj_ref, u_ref, w_ref, b_ref, *rest):
        if with_relu_out:
            out_ref, relu_ref, acc_ref = rest
        else:
            out_ref, acc_ref = rest
            relu_ref = None
        k = pl.program_id(1)

        @pl.when(k == 0)
        def _():
            acc_ref[...] = jnp.zeros_like(acc_ref)

        if u_resident:
            # U is the full panel (resident in VMEM); take this k-tile's slice.
            start = pl.multiple_of(k * tk, tk)
            u_tile = u_ref[pl.ds(start, tk), :]
        else:
            u_tile = u_ref[...]

        acc_ref[...] += jnp.dot(adj_ref[...], u_tile,
                                preferred_element_type=jnp.float32)

        @pl.when(k == pl.num_programs(1) - 1)
        def _():
            # Tiny channel transform once per output row tile, in bf16 on MXU.
            h = (jnp.dot(acc_ref[...].astype(jnp.bfloat16), w_ref[...],
                         preferred_element_type=jnp.float32) + b_ref[...])
            out_ref[...] = h
            if with_relu_out:
                # Fused ReLU + bf16 cast (lane-dense 128-wide store) -> feeds
                # layer 2 directly without a separate XLA elementwise pass.
                # TODO(synk): training-mode dropout would also go here.
                relu_ref[...] = jnp.maximum(h, 0.0).astype(jnp.bfloat16)
    return kernel


def _gcn_layer(adj, u, w, b, *, tm, tk, with_relu_out, u_resident):
    n_rows, n_cols = adj.shape
    cp = u.shape[1]
    op = w.shape[1]
    grid = (n_rows // tm, n_cols // tk)

    if u_resident:
        u_spec = pl.BlockSpec((n_cols, cp), lambda i, k: (0, 0))   # resident
    else:
        u_spec = pl.BlockSpec((tk, cp), lambda i, k: (k, 0))       # streamed

    in_specs = [
        pl.BlockSpec((tm, tk), lambda i, k: (i, k)),   # A_hat tile (bf16)
        u_spec,                                        # U panel    (bf16)
        pl.BlockSpec((cp, op), lambda i, k: (0, 0)),   # W          (bf16)
        pl.BlockSpec((1, op), lambda i, k: (0, 0)),    # bias       (f32)
    ]
    out_row_spec = pl.BlockSpec((tm, op), lambda i, k: (i, 0))
    if with_relu_out:
        out_shape = (jax.ShapeDtypeStruct((n_rows, op), jnp.float32),
                     jax.ShapeDtypeStruct((n_rows, op), jnp.bfloat16))
        out_specs = [out_row_spec, out_row_spec]
    else:
        out_shape = jax.ShapeDtypeStruct((n_rows, op), jnp.float32)
        out_specs = out_row_spec

    return pl.pallas_call(
        _make_layer_kernel(tk=tk, u_resident=u_resident,
                           with_relu_out=with_relu_out),
        out_shape=out_shape,
        grid_spec=pltpu.PrefetchScalarGridSpec(
            num_scalar_prefetch=0,
            grid=grid,
            in_specs=in_specs,
            out_specs=out_specs,
            scratch_shapes=[pltpu.VMEM((tm, cp), jnp.float32)],
        ),
        compiler_params=pltpu.CompilerParams(
            dimension_semantics=("parallel", "arbitrary"),
            vmem_limit_bytes=_tiled_vmem_limit()),
    )(adj, u, w, b)


# ----------------------------------------------------------------------------
# Wrapper: padding / dtype plumbing + size dispatch.
# ----------------------------------------------------------------------------
def prepare_adjacency(adj_hat, *, tm=_TM_DEFAULT, tk=_TK_DEFAULT,
                      fused_max_nodes=None):
    """bf16-cast (and, for the tiled path, pad) A_hat.

    Hoist this out of the per-step forward path and cache the result when the
    graph is static across calls -- doing it per call re-reads N^2 f32 and
    writes the padded bf16 copy (~1.5x one kernel layer's HBM traffic).
    """
    n = adj_hat.shape[0]
    fmax = _fused_max_nodes_default() if fused_max_nodes is None else fused_max_nodes
    if n <= fmax:
        return adj_hat.astype(jnp.bfloat16)
    return _pad2d(adj_hat, _round_up(n, tm), _round_up(n, tk), jnp.bfloat16)


def simple_gcn_forward(adj_hat, x, w1, b1, w2, b2, *,
                       tm=_TM_DEFAULT, tk=_TK_DEFAULT,
                       fused_max_nodes=None,
                       max_resident_u_bytes=16 * _MIB,
                       adj_prepared=None):
    """Eval-mode fused 2-layer GCN forward. Returns (out, x_hidden) in float32.

    # TODO(synk): training-mode dropout (p=0.5) and the input_hidden=True
    # entry point of SimpleGCN.forward are not implemented (eval, default path).
    """
    n, cin = x.shape
    hid = w1.shape[1]
    out_c = w2.shape[1]

    cp = _round_up(cin, _LANES)
    hp = _round_up(hid, _LANES)
    op = _round_up(out_c, _LANES)

    fmax = _fused_max_nodes_default() if fused_max_nodes is None else fused_max_nodes

    # bf16 weights feed the epilogue channel matmul on the MXU (f32xf32 MXU
    # matmuls lower to multi-pass emulation); biases stay f32; padded lanes
    # stay exactly zero.
    w1p = _pad2d(w1, cp, hp, jnp.bfloat16)
    b1p = _pad2d(jnp.reshape(b1, (1, -1)), 1, hp, jnp.float32)
    w2p = _pad2d(w2, hp, op, jnp.bfloat16)
    b2p = _pad2d(jnp.reshape(b2, (1, -1)), 1, op, jnp.float32)

    if n <= fmax:
        # Small/mid graph: A_hat resident in VMEM for both layers, one HBM read.
        adj_b = (adj_prepared.astype(jnp.bfloat16) if adj_prepared is not None
                 else adj_hat.astype(jnp.bfloat16))
        assert adj_b.shape == (n, n)
        xp = _pad2d(x, n, cp, jnp.bfloat16)
        out_p, hid_p = _fused_call(adj_b, xp, w1p, b1p, w2p, b2p)
        return out_p[:, :out_c], hid_p[:, :hid]

    # ---- large graph: per-layer tiled, pipelined, megacore-parallel kernels.
    n_row_pad = _round_up(n, tm)          # A rows / output rows
    n_col_pad = _round_up(n, tk)          # A cols / U rows (decoupled padding)
    adj_b = (adj_prepared.astype(jnp.bfloat16) if adj_prepared is not None
             else _pad2d(adj_hat, n_row_pad, n_col_pad, jnp.bfloat16))
    assert adj_b.shape == (n_row_pad, n_col_pad)

    # Keep the U panel resident in VMEM across row tiles when its (double
    # buffered) footprint fits; otherwise stream it per k-tile.
    def resident(rows, cols):
        return 2 * rows * cols * 2 <= max_resident_u_bytes

    xp = _pad2d(x, n_col_pad, cp, jnp.bfloat16)

    # Layer 1: h1 (f32, = x_hidden) and relu(h1) (bf16) fused in the epilogue.
    h1, h1r = _gcn_layer(adj_b, xp, w1p, b1p, tm=tm, tk=tk,
                         with_relu_out=True,
                         u_resident=resident(n_col_pad, cp))

    # Re-pad rows of the relu'd hidden to layer 2's contraction padding
    # (padded rows multiply zero A columns, so zeros are inert).
    if n_col_pad > n_row_pad:
        h1r = jnp.pad(h1r, ((0, n_col_pad - n_row_pad), (0, 0)))
    elif n_col_pad < n_row_pad:
        h1r = h1r[:n_col_pad]

    out_p = _gcn_layer(adj_b, h1r, w2p, b2p, tm=tm, tk=tk,
                       with_relu_out=False,
                       u_resident=resident(n_col_pad, hp))
    return out_p[:n, :out_c], h1[:n, :hid]


# ----------------------------------------------------------------------------
# Glue: GCN normalization  A_hat = D^{-1/2} (A + I) D^{-1/2}
# ----------------------------------------------------------------------------
def gcn_normalized_adjacency(edge_index, edge_weight, num_nodes):
    src, dst = edge_index[0], edge_index[1]
    if edge_weight is None:
        edge_weight = jnp.ones(src.shape[0], dtype=jnp.float32)
    # messages flow src -> dst: row = dst, col = src (PyG convention)
    adj = jnp.zeros((num_nodes, num_nodes), dtype=jnp.float32)
    adj = adj.at[dst, src].add(edge_weight)
    adj = adj + jnp.eye(num_nodes, dtype=jnp.float32)  # self-loops (weight 1)
    deg = adj.sum(axis=1)
    d_inv_sqrt = jnp.where(deg > 0, 1.0 / jnp.sqrt(deg), 0.0)
    return d_inv_sqrt[:, None] * adj * d_inv_sqrt[None, :]


# ----------------------------------------------------------------------------
# Pure-JAX f32 reference for correctness checks
# ----------------------------------------------------------------------------
def _reference(adj_hat, x, w1, b1, w2, b2):
    h1 = adj_hat @ (x @ w1) + b1
    out = adj_hat @ (jnp.maximum(h1, 0.0) @ w2) + b2
    return out, h1


def _check(name, got, want, tol=5e-2):
    # bf16 MXU operands (A, U, W) with f32 accumulation -> scale-relative bound.
    err = float(jnp.max(jnp.abs(got - want)) / (jnp.max(jnp.abs(want)) + 1e-6))
    assert err < tol, f"{name}: relative error {err:.4f} exceeds {tol}"


if __name__ == "__main__":
    root = jax.random.PRNGKey(0)

    def glorot(k, fan_in, fan_out):
        lim = jnp.sqrt(6.0 / (fan_in + fan_out))
        return jax.random.uniform(k, (fan_in, fan_out), jnp.float32, -lim, lim)

    def make_case(key, num_nodes, num_edges, cin, hid, cout):
        k_src, k_dst, k_attr, k_x, k_w1, k_w2 = jax.random.split(key, 6)
        x = jax.random.normal(k_x, (num_nodes, cin), dtype=jnp.float32)
        edge_index = jnp.stack([
            jax.random.randint(k_src, (num_edges,), 0, num_nodes),
            jax.random.randint(k_dst, (num_edges,), 0, num_nodes),
        ]).astype(jnp.int32)
        edge_attr = jax.random.uniform(k_attr, (num_edges,), dtype=jnp.float32)
        w1 = glorot(k_w1, cin, hid)
        b1 = jnp.zeros((1, hid), jnp.float32)
        w2 = glorot(k_w2, hid, cout)
        b2 = jnp.zeros((1, cout), jnp.float32)
        adj_hat = gcn_normalized_adjacency(edge_index, edge_attr, num_nodes)
        return adj_hat, x, w1, b1, w2, b2

    fwd = jax.jit(simple_gcn_forward,
                  static_argnames=("tm", "tk", "fused_max_nodes",
                                   "max_resident_u_bytes"))

    # Case 1: tiny graph -> fused whole-array fast path.
    adj, x, w1, b1, w2, b2 = make_case(jax.random.fold_in(root, 1),
                                       num_nodes=64, num_edges=256,
                                       cin=16, hid=32, cout=8)
    out, hidden = fwd(adj, x, w1, b1, w2, b2)
    jax.block_until_ready((out, hidden))
    ref_out, ref_hid = _reference(adj, x, w1, b1, w2, b2)
    assert out.shape == (64, 8) and hidden.shape == (64, 32)
    _check("small/out", out, ref_out)
    _check("small/hidden", hidden, ref_hid)

    # Case 2: mid graph -> still the fused A-resident path on every generation.
    adj, x, w1, b1, w2, b2 = make_case(jax.random.fold_in(root, 2),
                                       num_nodes=512, num_edges=4096,
                                       cin=16, hid=32, cout=8)
    out, hidden = fwd(adj, x, w1, b1, w2, b2)
    jax.block_until_ready((out, hidden))
    ref_out, ref_hid = _reference(adj, x, w1, b1, w2, b2)
    assert out.shape == (512, 8) and hidden.shape == (512, 32)
    _check("mid-fused/out", out, ref_out)
    _check("mid-fused/hidden", hidden, ref_hid)

    # Case 3: forced tiled path, resident-U variant, multi-step accumulation.
    out, hidden = fwd(adj, x, w1, b1, w2, b2, tm=256, tk=256,
                      fused_max_nodes=0)
    jax.block_until_ready((out, hidden))
    assert out.shape == (512, 8) and hidden.shape == (512, 32)
    _check("tiled-resident/out", out, ref_out)
    _check("tiled-resident/hidden", hidden, ref_hid)

    # Case 4: forced tiled path with big tiles, streaming-U variant, decoupled
    # row/col padding, and a pre-prepared (hoisted) bf16 adjacency.
    adj, x, w1, b1, w2, b2 = make_case(jax.random.fold_in(root, 3),
                                       num_nodes=1100, num_edges=8000,
                                       cin=16, hid=32, cout=8)
    adj_prep = prepare_adjacency(adj, tm=512, tk=1024, fused_max_nodes=0)
    out, hidden = fwd(adj, x, w1, b1, w2, b2, tm=512, tk=1024,
                      fused_max_nodes=0, max_resident_u_bytes=0,
                      adj_prepared=adj_prep)
    jax.block_until_ready((out, hidden))
    ref_out, ref_hid = _reference(adj, x, w1, b1, w2, b2)
    assert out.shape == (1100, 8) and hidden.shape == (1100, 32)
    _check("tiled-streaming/out", out, ref_out)
    _check("tiled-streaming/hidden", hidden, ref_hid)

    print("KERNEL_OK")
</pallas_src>

<mosaic_0001>
module attributes {stable_mosaic.version = 11 : i64} {
  func.func @_gcn_fused_kernel(%arg0: i32, %arg1: memref<64x64xbf16, #tpu.memory_space<vmem>>, %arg2: memref<64x128xbf16, #tpu.memory_space<vmem>>, %arg3: memref<128x128xbf16, #tpu.memory_space<vmem>>, %arg4: memref<1x128xf32, #tpu.memory_space<vmem>>, %arg5: memref<128x128xbf16, #tpu.memory_space<vmem>>, %arg6: memref<1x128xf32, #tpu.memory_space<vmem>>, %arg7: memref<64x128xf32, #tpu.memory_space<vmem>>, %arg8: memref<64x128xf32, #tpu.memory_space<vmem>>) attributes {dimension_semantics = [#tpu.dimension_semantics<arbitrary>], iteration_bounds = array<i64: 1>, scalar_prefetch = 0 : i64, scratch_operands = 0 : i64, tpu.core_type = #tpu.core_type<tc>, window_params = [{pipeline_mode = #tpu.pipeline_mode<synchronous>, transform_indices = @transform_0, window_bounds = array<i64: 64, 64>}, {pipeline_mode = #tpu.pipeline_mode<synchronous>, transform_indices = @transform_1, window_bounds = array<i64: 64, 128>}, {pipeline_mode = #tpu.pipeline_mode<synchronous>, transform_indices = @transform_2, window_bounds = array<i64: 128, 128>}, {pipeline_mode = #tpu.pipeline_mode<synchronous>, transform_indices = @transform_3, window_bounds = array<i64: 1, 128>}, {pipeline_mode = #tpu.pipeline_mode<synchronous>, transform_indices = @transform_4, window_bounds = array<i64: 128, 128>}, {pipeline_mode = #tpu.pipeline_mode<synchronous>, transform_indices = @transform_5, window_bounds = array<i64: 1, 128>}, {pipeline_mode = #tpu.pipeline_mode<synchronous>, transform_indices = @transform_6, window_bounds = array<i64: 64, 128>}, {pipeline_mode = #tpu.pipeline_mode<synchronous>, transform_indices = @transform_7, window_bounds = array<i64: 64, 128>}]} {
    %c0 = arith.constant 0 : index
    %c0_0 = arith.constant 0 : index
    %0 = vector.load %arg1[%c0, %c0_0] : memref<64x64xbf16, #tpu.memory_space<vmem>>, vector<64x64xbf16>
    %c0_1 = arith.constant 0 : index
    %c0_2 = arith.constant 0 : index
    %1 = vector.load %arg2[%c0_1, %c0_2] : memref<64x128xbf16, #tpu.memory_space<vmem>>, vector<64x128xbf16>
    %cst = arith.constant dense<0.000000e+00> : vector<64x128xf32>
    %2 = tpu.matmul %0, %1, %cst {dimension_numbers = #tpu.dot_dimension_numbers<[1], [0], [0], [1], [0, 0, 1, 1], [], []>} : vector<64x64xbf16>, vector<64x128xbf16>, vector<64x128xf32> -> vector<64x128xf32>
    %3 = arith.truncf %2 : vector<64x128xf32> to vector<64x128xbf16>
    %c0_3 = arith.constant 0 : index
    %c0_4 = arith.constant 0 : index
    %4 = vector.load %arg3[%c0_3, %c0_4] : memref<128x128xbf16, #tpu.memory_space<vmem>>, vector<128x128xbf16>
    %cst_5 = arith.constant dense<0.000000e+00> : vector<64x128xf32>
    %5 = tpu.matmul %3, %4, %cst_5 {dimension_numbers = #tpu.dot_dimension_numbers<[1], [0], [0], [1], [0, 0, 1, 1], [], []>} : vector<64x128xbf16>, vector<128x128xbf16>, vector<64x128xf32> -> vector<64x128xf32>
    %c0_6 = arith.constant 0 : index
    %c0_7 = arith.constant 0 : index
    %6 = vector.load %arg4[%c0_6, %c0_7] : memref<1x128xf32, #tpu.memory_space<vmem>>, vector<1x128xf32>
    %7 = vector.broadcast %6 : vector<1x128xf32> to vector<64x128xf32>
    %8 = arith.addf %5, %7 : vector<64x128xf32>
    %c0_8 = arith.constant 0 : index
    %c0_9 = arith.constant 0 : index
    %9 = vector.load %arg8[%c0_8, %c0_9] : memref<64x128xf32, #tpu.memory_space<vmem>>, vector<64x128xf32>
    tpu.vector_store %arg8[%c0_8, %c0_9], %8 {strides = array<i32>} : memref<64x128xf32, #tpu.memory_space<vmem>>, vector<64x128xf32>,
    %cst_10 = arith.constant 0.000000e+00 : f32
    %10 = vector.broadcast %cst_10 : f32 to vector<64x128xf32>
    %11 = arith.maximumf %8, %10 : vector<64x128xf32>
    %12 = arith.truncf %11 : vector<64x128xf32> to vector<64x128xbf16>
    %cst_11 = arith.constant dense<0.000000e+00> : vector<64x128xf32>
    %13 = tpu.matmul %0, %12, %cst_11 {dimension_numbers = #tpu.dot_dimension_numbers<[1], [0], [0], [1], [0, 0, 1, 1], [], []>} : vector<64x64xbf16>, vector<64x128xbf16>, vector<64x128xf32> -> vector<64x128xf32>
    %14 = arith.truncf %13 : vector<64x128xf32> to vector<64x128xbf16>
    %c0_12 = arith.constant 0 : index
    %c0_13 = arith.constant 0 : index
    %15 = vector.load %arg5[%c0_12, %c0_13] : memref<128x128xbf16, #tpu.memory_space<vmem>>, vector<128x128xbf16>
    %cst_14 = arith.constant dense<0.000000e+00> : vector<64x128xf32>
    %16 = tpu.matmul %14, %15, %cst_14 {dimension_numbers = #tpu.dot_dimension_numbers<[1], [0], [0], [1], [0, 0, 1, 1], [], []>} : vector<64x128xbf16>, vector<128x128xbf16>, vector<64x128xf32> -> vector<64x128xf32>
    %c0_15 = arith.constant 0 : index
    %c0_16 = arith.constant 0 : index
    %17 = vector.load %arg6[%c0_15, %c0_16] : memref<1x128xf32, #tpu.memory_space<vmem>>, vector<1x128xf32>
    %18 = vector.broadcast %17 : vector<1x128xf32> to vector<64x128xf32>
    %19 = arith.addf %16, %18 : vector<64x128xf32>
    %c0_17 = arith.constant 0 : index
    %c0_18 = arith.constant 0 : index
    %20 = vector.load %arg7[%c0_17, %c0_18] : memref<64x128xf32, #tpu.memory_space<vmem>>, vector<64x128xf32>
    tpu.vector_store %arg7[%c0_17, %c0_18], %19 {strides = array<i32>} : memref<64x128xf32, #tpu.memory_space<vmem>>, vector<64x128xf32>,
    return
  }
  func.func @transform_0(%arg0: i32) -> (i32, i32) {
    %c0_i32 = arith.constant 0 : i32
    %c0_i32_0 = arith.constant 0 : i32
    %c0_i32_1 = arith.constant 0 : i32
    return %c0_i32, %c0_i32_0 : i32, i32
  }
  func.func @transform_1(%arg0: i32) -> (i32, i32) {
    %c0_i32 = arith.constant 0 : i32
    %c0_i32_0 = arith.constant 0 : i32
    %c0_i32_1 = arith.constant 0 : i32
    return %c0_i32, %c0_i32_0 : i32, i32
  }
  func.func @transform_2(%arg0: i32) -> (i32, i32) {
    %c0_i32 = arith.constant 0 : i32
    %c0_i32_0 = arith.constant 0 : i32
    %c0_i32_1 = arith.constant 0 : i32
    return %c0_i32, %c0_i32_0 : i32, i32
  }
  func.func @transform_3(%arg0: i32) -> (i32, i32) {
    %c0_i32 = arith.constant 0 : i32
    %c0_i32_0 = arith.constant 0 : i32
    %c0_i32_1 = arith.constant 0 : i32
    return %c0_i32, %c0_i32_0 : i32, i32
  }
  func.func @transform_4(%arg0: i32) -> (i32, i32) {
    %c0_i32 = arith.constant 0 : i32
    %c0_i32_0 = arith.constant 0 : i32
    %c0_i32_1 = arith.constant 0 : i32
    return %c0_i32, %c0_i32_0 : i32, i32
  }
  func.func @transform_5(%arg0: i32) -> (i32, i32) {
    %c0_i32 = arith.constant 0 : i32
    %c0_i32_0 = arith.constant 0 : i32
    %c0_i32_1 = arith.constant 0 : i32
    return %c0_i32, %c0_i32_0 : i32, i32
  }
  func.func @transform_6(%arg0: i32) -> (i32, i32) {
    %c0_i32 = arith.constant 0 : i32
    %c0_i32_0 = arith.constant 0 : i32
    %c0_i32_1 = arith.constant 0 : i32
    return %c0_i32, %c0_i32_0 : i32, i32
  }
  func.func @transform_7(%arg0: i32) -> (i32, i32) {
    %c0_i32 = arith.constant 0 : i32
    %c0_i32_0 = arith.constant 0 : i32
    %c0_i32_1 = arith.constant 0 : i32
    return %c0_i32, %c0_i32_0 : i32, i32
  }
}

</mosaic_0001>

<bundles_post_ra>
// kernel: simple_gcn_forward.1
= control target key start
LH: loop header
LB: loop body
LE: loop exit
PB: predicated region body
PF: predicated region fallthrough
CT: control target
= control target key end

     0   :  { %vm86_vm0 = vcmask 523264   ;;  %s909_s1 = inlined_call_operand.vmem [shape: bf16[64,128], index: 1, kind: input, shape index: {}]   ;;  %s910_s0 = inlined_call_operand.vmem [shape: bf16[64,64], index: 0, kind: input, shape index: {}]   ;;  %s911_s2 = inlined_call_operand.vmem [shape: bf16[128,128], index: 2, kind: input, shape index: {}]   ;;  %s912_s4 = inlined_call_operand.vmem [shape: bf16[128,128], index: 4, kind: input, shape index: {}]   ;;  %s913_s3 = inlined_call_operand.vmem [shape: f32[1,128], index: 3, kind: input, shape index: {}]   ;;  %s914_s7 = inlined_call_operand.vmem [shape: f32[64,128], index: 7, kind: output, shape index: {1}]   ;;  %s915_s5 = inlined_call_operand.vmem [shape: f32[1,128], index: 5, kind: input, shape index: {}]   ;;  %s916_s6 = inlined_call_operand.vmem [shape: f32[64,128], index: 6, kind: output, shape index: {0}]  }
   0x1   :  { %v699_v0 = vld [vmem:[%s909_s1] sm:$0xff]   ;;  %v700_v1 = vld [vmem:[%s909_s1 + $0x8] sm:$0xff]   ;;  %v701_v2 = vld [vmem:[%s909_s1 + $0x10] sm:$0xff]  }
   0x2   :  { %619 = vmatprep.subr.bf16.mxu1 %v699_v0  ;;  %v703_v3 = vld [vmem:[%s910_s0] sm:$0xff]   ;;  %v702_v4 = vld [vmem:[%s909_s1 + $0x18] sm:$0xff]   ;;  %v786_v6 = vld [vmem:[%s910_s0 + $0x8] sm:$0xff]  }
   0x3   :  { %620 = vmatpush3.bf16.msra.mxu1 %v699_v0  ;;  %627 = vmatprep.mubr.msk.bf16.mxu1 %vm86_vm0, %v703_v3  ;;  %v707_v5 = vld [vmem:[%s911_s2] sm:$0xff]   ;;  %v791_v7 = vld [vmem:[%s910_s0 + $0x10] sm:$0xff]   ;;  %v708_v8 = vld [vmem:[%s911_s2 + $0x8] sm:$0xff]  }
   0x4   :  { %621 = vmatprep.subr.bf16.mxu1 %v700_v1  ;;  %667 = vmatprep.mubr.msk.bf16.mxu0 %vm86_vm0, %v703_v3  ;;  %v709_v9 = vld [vmem:[%s911_s2 + $0x10] sm:$0xff]   ;;  %v806_v10 = vld [vmem:[%s910_s0 + $0x18] sm:$0xff]   ;;  %v711_v12 = vld [vmem:[%s911_s2 + $0x20] sm:$0xff]  }
   0x5   :  { %v710_v11 = vld [vmem:[%s911_s2 + $0x18] sm:$0xff]   ;;  %v712_v13 = vld [vmem:[%s911_s2 + $0x28] sm:$0xff]   ;;  %v713_v14 = vld [vmem:[%s911_s2 + $0x30] sm:$0xff]  }
   0x6   :  { %v714_v15 = vld [vmem:[%s911_s2 + $0x38] sm:$0xff]   ;;  %v557_v28 = vld [vmem:[%s913_s3] ss:$0 sm:$0xff]  ;;  %v716_v58 = vld [vmem:[%s912_s4 + $0x8] sm:$0xff]  }
   0x7   :  { %622 = vmatpush3.bf16.msra.mxu1 %v700_v1  ;;  %v715_v57 = vld [vmem:[%s912_s4] sm:$0xff]   ;;  %v717_v59 = vld [vmem:[%s912_s4 + $0x10] sm:$0xff]   ;;  %v718_v60 = vld [vmem:[%s912_s4 + $0x18] sm:$0xff]  }
   0x8   :  { %623 = vmatprep.subr.bf16.mxu1 %v701_v2  ;;  %v719_v61 = vld [vmem:[%s912_s4 + $0x20] sm:$0xff]   ;;  %v720_v62 = vld [vmem:[%s912_s4 + $0x28] sm:$0xff]   ;;  %v721_v63 = vld [vmem:[%s912_s4 + $0x30] sm:$0xff]  }
   0x9   :  { %v722_v0 = vld [vmem:[%s912_s4 + $0x38] sm:$0xff]  }
   0xb   :  { %624 = vmatpush3.bf16.msra.mxu1 %v701_v2 }
   0xc   :  { %625 = vmatprep.subr.bf16.mxu1 %v702_v4 }
   0xf   :  { %626 = vmatpush3.bf16.msra.mxu1 %v702_v4 }
  0x10   :  { %635 = vmatprep.subr.bf16.mxu1 %v707_v5 }
  0x12   :  { %628 = vmatmul.mubr.msk.bf16.vlgmr.msra.gmra.mrb[0].mxu1 %vm86_vm0, %v786_v6 }
  0x13   :  { %631 = vmatprep.mubr.msk.bf16.mxu1 %vm86_vm0, %v791_v7  ;;  %636 = vmatpush3.bf16.msra.mxu1 %v707_v5 }
  0x14   :  { %637 = vmatprep.subr.bf16.mxu1 %v708_v8 }
  0x17   :  { %638 = vmatpush3.bf16.msra.mxu1 %v708_v8 }
  0x18   :  { %639 = vmatprep.subr.bf16.mxu1 %v709_v9 }
  0x1a   :  { %632 = vmatmul.mubr.msk.bf16.gmra.mrb[4].mxu1 %vm86_vm0, %v806_v10 }
  0x1b   :  { %640 = vmatpush3.bf16.msra.mxu1 %v709_v9 }
  0x1c   :  { %641 = vmatprep.subr.bf16.mxu1 %v710_v11 }
  0x1f   :  { %642 = vmatpush3.bf16.msra.mxu1 %v710_v11 }
  0x20   :  { %643 = vmatprep.subr.bf16.mxu1 %v711_v12 }
  0x23   :  { %644 = vmatpush3.bf16.msra.mxu1 %v711_v12 }
  0x24   :  { %645 = vmatprep.subr.bf16.mxu1 %v712_v13 }
  0x27   :  { %646 = vmatpush3.bf16.msra.mxu1 %v712_v13  ;;  %v570_v13 = vld [vmem:[%s915_s5] ss:$0 sm:$0xff] }
  0x28   :  { %647 = vmatprep.subr.bf16.mxu1 %v713_v14 }
  0x2b   :  { %648 = vmatpush3.bf16.msra.mxu1 %v713_v14 }
  0x2c   :  { %649 = vmatprep.subr.bf16.mxu1 %v714_v15 }
  0x2f   :  { %650 = vmatpush3.bf16.msra.mxu1 %v714_v15 }
  0xe5   :  { %v629_v16 = vpop.f32.mrb[0].mxu1 }
  0xe6   :  { %v133_v17 = vpop.f32.mrb[1].mxu1 }
  0xe7   :  { %v630_v18 = vpop.f32.mrb[2].mxu1 }
  0xe8   :  { %v165_v19 = vpack.c.bf16 %v630_v18, %v629_v16  ;;  %v136_v20 = vpop.f32.mrb[3].mxu1 }
  0xe9   :  { %v164_v21 = vpack.c.bf16 %v136_v20, %v133_v17 }
  0xeb   :  { %651 = vmatprep.mubr.bf16.mxu1 %v164_v21 }
  0xec   :  { %652 = vmatmul.mubr.bf16.vlgmr.msra.gmra.mrb[8].mxu1 %v165_v19 }
  0xed   :  { %v633_v22 = vpop.f32.mrb[4].mxu1 }
  0xee   :  { %v149_v23 = vpop.f32.mrb[5].mxu1 }
  0xef   :  { %v634_v24 = vpop.f32.mrb[6].mxu1 }
  0xf0   :  { %v167_v25 = vpack.c.bf16 %v634_v24, %v633_v22  ;;  %v152_v26 = vpop.f32.mrb[7].mxu1 }
  0xf1   :  { %v166_v27 = vpack.c.bf16 %v152_v26, %v149_v23 }
  0xf3   :  { %655 = vmatprep.mubr.bf16.mxu1 %v166_v27 }
  0xf4   :  { %656 = vmatmul.mubr.bf16.gmra.mrb[12].mxu1 %v167_v25 }
 0x1bf   :  { %v653_v29 = vpop.f32.mrb[8].mxu1 }
 0x1c0   :  { %v282_v30 = vadd.f32 %v653_v29, %v557_v28  ;;  %v273_v31 = vpop.f32.mrb[9].mxu1 }
 0x1c1   :  { %v274_v32 = vadd.f32 %v557_v28, %v273_v31  ;;  %v654_v33 = vpop.f32.mrb[10].mxu1 }
 0x1c2   :  { %306 = vst [vmem:[%s914_s7 + $0x10] sm:$0xff] %v282_v30  ;;  %v285_v34 = vadd.f32 %v654_v33, %v557_v28  ;;  %v276_v35 = vpop.f32.mrb[11].mxu1  ;;  %v314_v37 = vmax.f32 %v282_v30, 0.0 }
 0x1c3   :  { %304 = vst [vmem:[%s914_s7] sm:$0xff] %v274_v32  ;;  %v277_v36 = vadd.f32 %v557_v28, %v276_v35  ;;  %v312_v39 = vmax.f32 %v274_v32, 0.0 }
 0x1c4   :  { %307 = vst [vmem:[%s914_s7 + $0x18] sm:$0xff] %v285_v34  ;;  %v315_v38 = vmax.f32 %v285_v34, 0.0 }
 0x1c5   :  { %305 = vst [vmem:[%s914_s7 + $0x8] sm:$0xff] %v277_v36  ;;  %v313_v40 = vmax.f32 %v277_v36, 0.0 }
 0x1c6   :  { %v321_v41 = vpack.c.bf16 %v315_v38, %v314_v37 }
 0x1c7   :  { %v657_v42 = vpop.f32.mrb[12].mxu1  ;;  %v320_v43 = vpack.c.bf16 %v313_v40, %v312_v39 }
 0x1c8   :  { %v298_v44 = vadd.f32 %v657_v42, %v557_v28  ;;  %v289_v45 = vpop.f32.mrb[13].mxu1 }
 0x1c9   :  { %v290_v46 = vadd.f32 %v557_v28, %v289_v45  ;;  %v658_v47 = vpop.f32.mrb[14].mxu1  ;;  %659 = vmatprep.subr.bf16.mxu0 %v320_v43 }
 0x1ca   :  { %310 = vst [vmem:[%s914_s7 + $0x30] sm:$0xff] %v298_v44  ;;  %v301_v48 = vadd.f32 %v658_v47, %v557_v28  ;;  %v292_v49 = vpop.f32.mrb[15].mxu1  ;;  %660 = vmatpush3.bf16.msra.mxu0 %v320_v43  ;;  %v318_v51 = vmax.f32 %v298_v44, 0.0 }
 0x1cb   :  { %308 = vst [vmem:[%s914_s7 + $0x20] sm:$0xff] %v290_v46  ;;  %v293_v50 = vadd.f32 %v557_v28, %v292_v49  ;;  %661 = vmatprep.subr.bf16.mxu0 %v321_v41  ;;  %v316_v53 = vmax.f32 %v290_v46, 0.0 }
 0x1cc   :  { %311 = vst [vmem:[%s914_s7 + $0x38] sm:$0xff] %v301_v48  ;;  %v319_v52 = vmax.f32 %v301_v48, 0.0 }
 0x1cd   :  { %309 = vst [vmem:[%s914_s7 + $0x28] sm:$0xff] %v293_v50  ;;  %v317_v54 = vmax.f32 %v293_v50, 0.0 }
 0x1ce   :  { %662 = vmatpush3.bf16.msra.mxu0 %v321_v41  ;;  %v323_v55 = vpack.c.bf16 %v319_v52, %v318_v51 }
 0x1cf   :  { %v322_v56 = vpack.c.bf16 %v317_v54, %v316_v53 }
 0x1d1   :  { %663 = vmatprep.subr.bf16.mxu0 %v322_v56 }
 0x1d2   :  { %664 = vmatpush3.bf16.msra.mxu0 %v322_v56 }
 0x1d3   :  { %665 = vmatprep.subr.bf16.mxu0 %v323_v55 }
 0x1d6   :  { %666 = vmatpush3.bf16.msra.mxu0 %v323_v55 }
 0x1d7   :  { %675 = vmatprep.subr.bf16.mxu0 %v715_v57 }
 0x1d9   :  { %668 = vmatmul.mubr.msk.bf16.vlgmr.msra.gmra.mrb[0].mxu0 %vm86_vm0, %v786_v6 }
 0x1da   :  { %671 = vmatprep.mubr.msk.bf16.mxu0 %vm86_vm0, %v791_v7  ;;  %676 = vmatpush3.bf16.msra.mxu0 %v715_v57 }
 0x1db   :  { %677 = vmatprep.subr.bf16.mxu0 %v716_v58 }
 0x1de   :  { %678 = vmatpush3.bf16.msra.mxu0 %v716_v58 }
 0x1df   :  { %679 = vmatprep.subr.bf16.mxu0 %v717_v59 }
 0x1e1   :  { %672 = vmatmul.mubr.msk.bf16.gmra.mrb[4].mxu0 %vm86_vm0, %v806_v10 }
 0x1e2   :  { %680 = vmatpush3.bf16.msra.mxu0 %v717_v59 }
 0x1e3   :  { %681 = vmatprep.subr.bf16.mxu0 %v718_v60 }
 0x1e6   :  { %682 = vmatpush3.bf16.msra.mxu0 %v718_v60 }
 0x1e7   :  { %683 = vmatprep.subr.bf16.mxu0 %v719_v61 }
 0x1ea   :  { %684 = vmatpush3.bf16.msra.mxu0 %v719_v61 }
 0x1eb   :  { %685 = vmatprep.subr.bf16.mxu0 %v720_v62 }
 0x1ee   :  { %686 = vmatpush3.bf16.msra.mxu0 %v720_v62 }
 0x1ef   :  { %687 = vmatprep.subr.bf16.mxu0 %v721_v63 }
 0x1f2   :  { %688 = vmatpush3.bf16.msra.mxu0 %v721_v63 }
 0x1f3   :  { %689 = vmatprep.subr.bf16.mxu0 %v722_v0 }
 0x1f6   :  { %690 = vmatpush3.bf16.msra.mxu0 %v722_v0 }
 0x2ac   :  { %v669_v1 = vpop.f32.mrb[0].mxu0 }
 0x2ad   :  { %v358_v2 = vpop.f32.mrb[1].mxu0 }
 0x2ae   :  { %v670_v3 = vpop.f32.mrb[2].mxu0 }
 0x2af   :  { %v390_v4 = vpack.c.bf16 %v670_v3, %v669_v1  ;;  %v361_v5 = vpop.f32.mrb[3].mxu0 }
 0x2b0   :  { %v389_v6 = vpack.c.bf16 %v361_v5, %v358_v2 }
 0x2b2   :  { %691 = vmatprep.mubr.bf16.mxu0 %v389_v6 }
 0x2b3   :  { %692 = vmatmul.mubr.bf16.vlgmr.msra.gmra.mrb[8].mxu0 %v390_v4 }
 0x2b4   :  { %v673_v7 = vpop.f32.mrb[4].mxu0 }
 0x2b5   :  { %v374_v8 = vpop.f32.mrb[5].mxu0 }
 0x2b6   :  { %v674_v9 = vpop.f32.mrb[6].mxu0 }
 0x2b7   :  { %v392_v10 = vpack.c.bf16 %v674_v9, %v673_v7  ;;  %v377_v11 = vpop.f32.mrb[7].mxu0 }
 0x2b8   :  { %v391_v12 = vpack.c.bf16 %v377_v11, %v374_v8 }
 0x2ba   :  { %695 = vmatprep.mubr.bf16.mxu0 %v391_v12 }
 0x2bb   :  { %696 = vmatmul.mubr.bf16.gmra.mrb[12].mxu0 %v392_v10 }
 0x386   :  { %v693_v14 = vpop.f32.mrb[8].mxu0 }
 0x387   :  { %v507_v15 = vadd.f32 %v693_v14, %v570_v13  ;;  %v498_v16 = vpop.f32.mrb[9].mxu0 }
 0x388   :  { %v499_v17 = vadd.f32 %v570_v13, %v498_v16  ;;  %v694_v18 = vpop.f32.mrb[10].mxu0 }
 0x389   :  { %531 = vst [vmem:[%s916_s6 + $0x10] sm:$0xff] %v507_v15  ;;  %v510_v19 = vadd.f32 %v694_v18, %v570_v13  ;;  %v501_v20 = vpop.f32.mrb[11].mxu0 }
 0x38a   :  { %529 = vst [vmem:[%s916_s6] sm:$0xff] %v499_v17  ;;  %v502_v21 = vadd.f32 %v570_v13, %v501_v20 }
 0x38b   :  { %532 = vst [vmem:[%s916_s6 + $0x18] sm:$0xff] %v510_v19 }
 0x38c   :  { %530 = vst [vmem:[%s916_s6 + $0x8] sm:$0xff] %v502_v21 }
 0x38e   :  { %v697_v22 = vpop.f32.mrb[12].mxu0 }
 0x38f   :  { %v523_v23 = vadd.f32 %v697_v22, %v570_v13  ;;  %v514_v24 = vpop.f32.mrb[13].mxu0 }
 0x390   :  { %v515_v25 = vadd.f32 %v570_v13, %v514_v24  ;;  %v698_v26 = vpop.f32.mrb[14].mxu0 }
 0x391   :  { %535 = vst [vmem:[%s916_s6 + $0x30] sm:$0xff] %v523_v23  ;;  %v526_v27 = vadd.f32 %v698_v26, %v570_v13  ;;  %v517_v28 = vpop.f32.mrb[15].mxu0 }
 0x392   :  { %533 = vst [vmem:[%s916_s6 + $0x20] sm:$0xff] %v515_v25  ;;  %v518_v29 = vadd.f32 %v570_v13, %v517_v28 }
 0x393   :  { %536 = vst [vmem:[%s916_s6 + $0x38] sm:$0xff] %v526_v27 }
 0x394   :  { %534 = vst [vmem:[%s916_s6 + $0x28] sm:$0xff] %v518_v29 }

</bundles_post_ra>
